<compile_context>
chip_gen: v5e
topology: v5e:2x2
jax: 0.10.0
libtpu: 0.0.40
codegen_flags: <defaults>
</compile_context>

<pallas_src>
import functools

import jax
import jax.numpy as jnp
from jax.experimental import pallas as pl
from jax.experimental.pallas import tpu as pltpu


def _round_up(x, m):
    return ((x + m - 1) // m) * m


# ----------------------------------------------------------------------------
# Pallas kernels
# ----------------------------------------------------------------------------
def _copy_kernel(x_ref, o_ref):
    # forward(x) == x
    o_ref[...] = x_ref[...]


def _fused_hyper_kernel(x_ref, w1_ref, b1_ref, w2_ref, b2_ref, o_ref):
    # All four heads at once:
    #   y = relu(x @ W1_cat + b1_cat) @ W2_blockdiag + b2_cat
    h = jnp.dot(x_ref[...], w1_ref[...], preferred_element_type=jnp.float32)
    h = jnp.maximum(h + b1_ref[...], 0.0)            # bias + ReLU in f32 (VPU)
    y = jnp.dot(h.astype(w2_ref.dtype), w2_ref[...],
                preferred_element_type=jnp.float32)
    o_ref[...] = (y + b2_ref[...]).astype(o_ref.dtype)


# ----------------------------------------------------------------------------
# Wrappers around pallas_call (cached / jitted per shape)
# ----------------------------------------------------------------------------
@functools.partial(jax.jit, static_argnames=("tile_r",))
def _identity_call(x2, tile_r):
    rows, cols = x2.shape
    return pl.pallas_call(
        _copy_kernel,
        out_shape=jax.ShapeDtypeStruct((rows, cols), x2.dtype),
        grid=(pl.cdiv(rows, tile_r),),
        in_specs=[pl.BlockSpec((tile_r, cols), lambda i: (i, 0))],
        out_specs=pl.BlockSpec((tile_r, cols), lambda i: (i, 0)),
        input_output_aliases={0: 0},   # free when the caller donates x
        compiler_params=pltpu.CompilerParams(
            dimension_semantics=("parallel",)),
    )(x2)


def pallas_identity(x):
    """Identity forward. Tiled copy with output aliased onto the input."""
    orig_shape = x.shape
    if x.ndim == 2:
        x2 = x
    elif x.ndim == 0:
        x2 = x.reshape(1, 1)
    else:
        x2 = x.reshape(-1, x.shape[-1])
    rows = x2.shape[0]
    tile_r = rows if rows <= 512 else 512
    y = _identity_call(x2, tile_r)
    return y.reshape(orig_shape)


@functools.partial(jax.jit, static_argnames=("tile_b",))
def _fused_hyper_call(x_pad, w1_cat, b1_cat, w2_bd, b2_cat, tile_b):
    B_pad, K = x_pad.shape
    H = w1_cat.shape[1]
    O = w2_bd.shape[1]
    return pl.pallas_call(
        _fused_hyper_kernel,
        out_shape=jax.ShapeDtypeStruct((B_pad, O), x_pad.dtype),
        grid=(B_pad // tile_b,),
        in_specs=[
            pl.BlockSpec((tile_b, K), lambda i: (i, 0)),   # batch-tiled input
            pl.BlockSpec((K, H), lambda i: (0, 0)),        # weights: constant
            pl.BlockSpec((1, H), lambda i: (0, 0)),        #   index_map ->
            pl.BlockSpec((H, O), lambda i: (0, 0)),        #   VMEM-resident
            pl.BlockSpec((1, O), lambda i: (0, 0)),
        ],
        out_specs=pl.BlockSpec((tile_b, O), lambda i: (i, 0)),
        compiler_params=pltpu.CompilerParams(
            dimension_semantics=("parallel",)),            # split over TCs (v7x)
    )(x_pad, w1_cat, b1_cat, w2_bd, b2_cat)


def pallas_fused_hyper(x, w1_cat, b1_cat, w2_bd, b2_cat):
    """Single fused call producing the concatenated (padded) head outputs.

    x:       [B, input_dim]
    w1_cat:  [input_dim, H_pad]   (concatenated first-layer weights, zero-padded)
    b1_cat:  [1, H_pad]
    w2_bd:   [H_pad, O_pad]       (block-diagonal second-layer weights)
    b2_cat:  [1, O_pad]
    returns  [B, O_pad]           (lane-dense; slice per head outside)
    """
    B, _ = x.shape
    # Pad batch to a sublane multiple and tile it (weights stay resident).
    B_pad = max(8, _round_up(B, 8))
    tile_b = 512 if B_pad > 512 else B_pad
    B_pad = _round_up(B_pad, tile_b)
    if B_pad != B:
        x = jnp.pad(x, ((0, B_pad - B), (0, 0)))
    out = _fused_hyper_call(x, w1_cat, b1_cat, w2_bd, b2_cat, tile_b)
    return out[:B]


# ----------------------------------------------------------------------------
# HyperLayers module
# ----------------------------------------------------------------------------
class HyperLayers:
    def __init__(self, input_dim, hypernet_embed, n_agents, embed_dim, key):
        self.input_dim = input_dim
        self.hypernet_embed = hypernet_embed
        self.n_agents = n_agents
        self.embed_dim = embed_dim

        def linear_params(key, fan_in, fan_out):
            kw, kb = jax.random.split(key)
            bound = 1.0 / jnp.sqrt(jnp.float32(fan_in))
            w = jax.random.uniform(kw, (fan_in, fan_out), jnp.float32,
                                   -bound, bound)
            b = jax.random.uniform(kb, (1, fan_out), jnp.float32,
                                   -bound, bound)
            return w, b

        # (name, hidden_dim, out_dim) — note b2's hidden layer is embed_dim.
        head_defs = [
            ("w1", hypernet_embed, n_agents * embed_dim),
            ("b1", hypernet_embed, embed_dim),
            ("w2", hypernet_embed, embed_dim),
            ("b2", embed_dim, 1),
        ]
        ks = jax.random.split(key, 2 * len(head_defs))
        self.head_params = {}
        per_head = []
        for idx, (name, hidden, out) in enumerate(head_defs):
            wa, ba = linear_params(ks[2 * idx], input_dim, hidden)
            wb, bb = linear_params(ks[2 * idx + 1], hidden, out)
            self.head_params[name] = (wa, ba, wb, bb)
            per_head.append((wa, ba, wb, bb))

        # Build fused parameters: concatenated layer-1, block-diagonal layer-2,
        # both padded to 128-lane-dense shapes (zero padding is exact in f32:
        # ReLU(0)=0 feeds zero rows of the block-diagonal, contributing 0).
        h_total = sum(h for _, h, _ in head_defs)
        o_total = sum(o for _, _, o in head_defs)
        h_pad = max(128, _round_up(h_total, 128))
        o_pad = max(128, _round_up(o_total, 128))
        w1_cat = jnp.zeros((input_dim, h_pad), jnp.float32)
        b1_cat = jnp.zeros((1, h_pad), jnp.float32)
        w2_bd = jnp.zeros((h_pad, o_pad), jnp.float32)
        b2_cat = jnp.zeros((1, o_pad), jnp.float32)
        self.head_slices = []
        h_off = o_off = 0
        for (wa, ba, wb, bb) in per_head:
            hd, od = wa.shape[1], wb.shape[1]
            w1_cat = w1_cat.at[:, h_off:h_off + hd].set(wa)
            b1_cat = b1_cat.at[:, h_off:h_off + hd].set(ba)
            w2_bd = w2_bd.at[h_off:h_off + hd, o_off:o_off + od].set(wb)
            b2_cat = b2_cat.at[:, o_off:o_off + od].set(bb)
            self.head_slices.append((o_off, o_off + od))
            h_off += hd
            o_off += od
        # TODO(synk): on v6e/v7x the fused weights could be stored in bf16
        # (MXU-native, halves VMEM traffic) since accumulation is already f32.
        self.fused_params = (w1_cat, b1_cat, w2_bd, b2_cat)

    # --- forward: identity, exactly like the PyTorch module ----------------
    def forward(self, x):
        return pallas_identity(x)

    __call__ = forward

    # --- hyper heads: one fused Pallas call, sliced per head ---------------
    def hyper_heads(self, x):
        y = pallas_fused_hyper(x, *self.fused_params)
        return tuple(y[:, lo:hi] for (lo, hi) in self.head_slices)

    def w1(self, x):
        return self.hyper_heads(x)[0]   # [B, n_agents * embed_dim]

    def b1(self, x):
        return self.hyper_heads(x)[1]   # [B, embed_dim]

    def w2(self, x):
        return self.hyper_heads(x)[2]   # [B, embed_dim]

    def b2(self, x):
        return self.hyper_heads(x)[3]   # [B, 1]


# ----------------------------------------------------------------------------
# Pure-JAX reference for correctness checking
# ----------------------------------------------------------------------------
def _ref_mlp2(x, w1, b1, w2, b2):
    h = jnp.maximum(x @ w1 + b1, 0.0)
    return h @ w2 + b2


if __name__ == "__main__":
    batch = 2
    input_dim = 32        # mixer state dim
    hypernet_embed = 32
    n_agents = 4
    embed_dim = 8

    key = jax.random.PRNGKey(0)
    k_params, k_x = jax.random.split(key)

    layers = HyperLayers(input_dim, hypernet_embed, n_agents, embed_dim,
                         k_params)
    x = jax.random.normal(k_x, (batch, input_dim), jnp.float32)

    # forward() — identity through the (aliased, tiled) Pallas copy kernel.
    y = layers(x)
    jax.block_until_ready(y)
    assert y.shape == x.shape and y.dtype == x.dtype
    assert jnp.allclose(y, x), "forward() must be the identity"

    # All four hyper heads from ONE fused Pallas call; verify each against a
    # pure-JAX reference built from the original per-head parameters.
    heads = layers.hyper_heads(x)
    jax.block_until_ready(heads)
    names = ["w1", "b1", "w2", "b2"]
    expected_dims = [n_agents * embed_dim, embed_dim, embed_dim, 1]
    for name, got, out_dim in zip(names, heads, expected_dims):
        want = _ref_mlp2(x, *layers.head_params[name])
        assert got.shape == (batch, out_dim), (name, got.shape)
        assert jnp.allclose(got, want, atol=1e-5, rtol=1e-5), name

    # Individual head method (reuses the same cached fused executable).
    b2_out = layers.b2(x)
    jax.block_until_ready(b2_out)
    assert jnp.allclose(b2_out, _ref_mlp2(x, *layers.head_params["b2"]),
                        atol=1e-5, rtol=1e-5)

    print("KERNEL_OK")
</pallas_src>

<mosaic_0001>
module attributes {stable_mosaic.version = 11 : i64} {
  func.func @_copy_kernel(%arg0: i32, %arg1: memref<2x32xf32, #tpu.memory_space<vmem>>, %arg2: memref<2x32xf32, #tpu.memory_space<vmem>>) attributes {dimension_semantics = [#tpu.dimension_semantics<parallel>], iteration_bounds = array<i64: 1>, scalar_prefetch = 0 : i64, scratch_operands = 0 : i64, tpu.core_type = #tpu.core_type<tc>, window_params = [{transform_indices = @transform_0, window_bounds = array<i64: 2, 32>}, {transform_indices = @transform_1, window_bounds = array<i64: 2, 32>}]} {
    %c0 = arith.constant 0 : index
    %c0_0 = arith.constant 0 : index
    %0 = vector.load %arg1[%c0, %c0_0] : memref<2x32xf32, #tpu.memory_space<vmem>>, vector<2x32xf32>
    %c0_1 = arith.constant 0 : index
    %c0_2 = arith.constant 0 : index
    %1 = vector.load %arg2[%c0_1, %c0_2] : memref<2x32xf32, #tpu.memory_space<vmem>>, vector<2x32xf32>
    tpu.vector_store %arg2[%c0_1, %c0_2], %0 {strides = array<i32>} : memref<2x32xf32, #tpu.memory_space<vmem>>, vector<2x32xf32>,
    return
  }
  func.func @transform_0(%arg0: i32) -> (i32, i32) {
    %c0_i32 = arith.constant 0 : i32
    %c0_i32_0 = arith.constant 0 : i32
    return %arg0, %c0_i32 : i32, i32
  }
  func.func @transform_1(%arg0: i32) -> (i32, i32) {
    %c0_i32 = arith.constant 0 : i32
    %c0_i32_0 = arith.constant 0 : i32
    return %arg0, %c0_i32 : i32, i32
  }
}

</mosaic_0001>

<bundles_post_ra>
// kernel: _identity_call.1
= control target key start
LH: loop header
LB: loop body
LE: loop exit
PB: predicated region body
PF: predicated region fallthrough
CT: control target
= control target key end

     0   :  { %6 = vsyncpa [#allocation3], 0  ;;  %s115_s0 = inlined_call_operand.hbm [shape: f32[2,32], index: 0, kind: input, shape index: {}, may-alias: {0,1}]   ;;  %s116_s1 = inlined_call_operand.hbm [shape: f32[2,32], index: 1, kind: output, shape index: {}, may-alias: {0,1}]  }
   0x1   :  { %7 = vsyncpa [#allocation4], 0  ;;  %s13_s8 = sshll.u32 %s115_s0, 4  ;;  %s97_s9 = smov [#allocation2]   ;;  %s14_s8 = int_to_ptr.hbm [resolvable:$true] %s13_s8 }
   0x2   :  { %s15_s10 = sshll.u32 %s97_s9, 4  ;;  %s16_s10 = int_to_ptr.vmem [resolvable:$true] %s15_s10 }
   0x3   :  { %18 = dma.hbm_to_vmem [thread:$0]  %s14_s8, 32, %s16_s10, [#allocation3]  }
   0x4   :  { %93 = dma.done.wait [#allocation3], 32  }
   0x5   :  { %94 = vsyncadd [#allocation3], 4294967264  ;;  %s98_s11 = smov [#allocation5]   ;;  %s33_s15 = sshll.u32 %s116_s1, 4  ;;  %vm24_vm0 = vcmask 254976   ;;  %s34_s15 = int_to_ptr.hbm [resolvable:$true] %s33_s15 }
   0x6   :  { %s31_s12 = sshll.u32 %s98_s11, 4  ;;  %v23_v0 = vld [vmem:[#allocation2] sm:$0x3]  ;;  %s32_s12 = int_to_ptr.vmem [resolvable:$true] %s31_s12 }
   0x7   :  { %25 = vst.msk [vmem:[#allocation5] sm:$0x3] %vm24_vm0, %v23_v0 }
   0x8   :  { %36 = dma.vmem_to_hbm [thread:$0]  %s32_s12, 32, %s34_s15, [#allocation4]  }
   0x9   :  { %95 = dma.done.wait [#allocation4], 32  }
   0xa   :  { %96 = vsyncadd [#allocation4], 4294967264 }
   0xb   :  { %41 = vsyncpa [#allocation3], 1 }
   0xc   :  { %42 = vsyncpa [#allocation4], 1 }

</bundles_post_ra>
